<compile_context>
chip_gen: v7x
topology: tpu7x:2x2x1
jax: 0.10.0
libtpu: 0.0.40
codegen_flags: <defaults>
</compile_context>

<pallas_src>
import math

import jax
import jax.numpy as jnp
from jax.experimental import pallas as pl
from jax.experimental.pallas import tpu as pltpu


_LANE = 128
_SUBLANE = 8
_COL_TARGET = 2048           # target lane width per tile (multiple of 128)
_TILE_BYTES = 2 * 1024 * 1024  # ~2 MiB per buffer => ~12 MiB pipelined footprint


def _glu_kernel(out_ref, gate_ref, y_ref):
    """Elementwise GLU hot path: y = out * sigmoid(gate)."""
    a = out_ref[...].astype(jnp.float32)
    g = gate_ref[...].astype(jnp.float32)
    # sigmoid(g) = 1 / (1 + exp(-g)); exp on EUP, divide/mul on VPU.
    sig = 1.0 / (1.0 + jnp.exp(-g))
    y_ref[...] = (a * sig).astype(y_ref.dtype)


def _pick_col_tile(cols: int, max_cols: int) -> int:
    """Largest lane-dense (multiple-of-128) divisor of `cols` <= max_cols.

    Falls back to the full extent when cols is not 128-aligned (full extent is
    always a legal block shape) or already small enough.
    """
    if cols % _LANE != 0 or cols <= max_cols:
        # TODO(synk): a huge non-128-aligned split extent would produce one
        # oversized block here; pad-and-mask would be needed for that case.
        return cols
    tc = (max_cols // _LANE) * _LANE
    while cols % tc != 0:
        tc -= _LANE
    return tc


def _pick_tiles(rows: int, cols: int, itemsize: int) -> tuple[int, int]:
    tc = _pick_col_tile(cols, _COL_TARGET)
    max_rows = max(_SUBLANE, _TILE_BYTES // max(1, tc * itemsize))
    if rows <= max_rows:
        tr = rows                       # full extent: always legal
    else:
        tr = max(_SUBLANE, (max_rows // _SUBLANE) * _SUBLANE)
    return tr, tc


def glu(x: jax.Array, dim: int) -> jax.Array:
    """Pallas implementation of torch GLU(dim).forward(x)."""
    dim = dim % x.ndim
    size = x.shape[dim]
    assert size % 2 == 0, "GLU split dim must be even"
    half = size // 2

    outer = math.prod(x.shape[:dim]) if dim > 0 else 1
    inner = math.prod(x.shape[dim + 1:]) if dim + 1 < x.ndim else 1

    rows = outer
    cols = half * inner                   # width of each half, per row

    # Row-major reshape (no data movement): columns [0, cols) == "out" half,
    # columns [cols, 2*cols) == "gate" half, for every row.
    x2 = x.reshape(rows, 2 * cols)

    itemsize = jnp.dtype(x.dtype).itemsize
    tr, tc = _pick_tiles(rows, cols, itemsize)
    col_blocks = cols // tc               # tc divides cols by construction
    grid = (pl.cdiv(rows, tr), col_blocks)

    y2 = pl.pallas_call(
        _glu_kernel,
        out_shape=jax.ShapeDtypeStruct((rows, cols), x.dtype),
        grid=grid,
        in_specs=[
            # "out" half: column blocks [0, col_blocks)
            pl.BlockSpec((tr, tc), lambda i, j: (i, j)),
            # "gate" half: same rows, shifted by col_blocks whole blocks
            pl.BlockSpec((tr, tc), lambda i, j, _off=col_blocks: (i, j + _off)),
        ],
        out_specs=pl.BlockSpec((tr, tc), lambda i, j: (i, j)),
        compiler_params=pltpu.CompilerParams(
            dimension_semantics=("parallel", "parallel"),
            vmem_limit_bytes=32 * 1024 * 1024,
        ),
    )(x2, x2)

    out_shape = list(x.shape)
    out_shape[dim] = half
    return y2.reshape(out_shape)


if __name__ == "__main__":
    key = jax.random.PRNGKey(0)
    # NCHW input, split along dim=1 (channels): B=2, C=4 (-> 2 per half), H=W=16.
    x = jax.random.normal(key, (2, 4, 16, 16), dtype=jnp.float32)
    dim = 1

    y = jax.block_until_ready(glu(x, dim))

    # Pure-JAX reference.
    out_half, gate_half = jnp.split(x, 2, axis=dim)
    y_ref = out_half * jax.nn.sigmoid(gate_half)

    assert y.shape == y_ref.shape, (y.shape, y_ref.shape)
    assert jnp.allclose(y, y_ref, atol=1e-5, rtol=1e-5), "mismatch vs reference"

    print("KERNEL_OK")
</pallas_src>

<mosaic_0001>
module attributes {stable_mosaic.version = 11 : i64} {
  func.func @_glu_kernel(%arg0: i32, %arg1: i32, %arg2: memref<2x512xf32, #tpu.memory_space<vmem>>, %arg3: memref<2x512xf32, #tpu.memory_space<vmem>>, %arg4: memref<2x512xf32, #tpu.memory_space<vmem>>) attributes {dimension_semantics = [#tpu.dimension_semantics<parallel>, #tpu.dimension_semantics<parallel>], iteration_bounds = array<i64: 1, 1>, scalar_prefetch = 0 : i64, scratch_operands = 0 : i64, tpu.core_type = #tpu.core_type<tc>, window_params = [{transform_indices = @transform_0, window_bounds = array<i64: 2, 512>}, {transform_indices = @transform_1, window_bounds = array<i64: 2, 512>}, {transform_indices = @transform_2, window_bounds = array<i64: 2, 512>}]} {
    %c0 = arith.constant 0 : index
    %c0_0 = arith.constant 0 : index
    %0 = vector.load %arg2[%c0, %c0_0] : memref<2x512xf32, #tpu.memory_space<vmem>>, vector<2x512xf32>
    %c0_1 = arith.constant 0 : index
    %c0_2 = arith.constant 0 : index
    %1 = vector.load %arg3[%c0_1, %c0_2] : memref<2x512xf32, #tpu.memory_space<vmem>>, vector<2x512xf32>
    %cst = arith.constant 0.000000e+00 : f32
    %2 = vector.broadcast %cst : f32 to vector<2x512xf32>
    %3 = arith.subf %2, %1 : vector<2x512xf32>
    %4 = math.exp %3 : vector<2x512xf32>
    %cst_3 = arith.constant 1.000000e+00 : f32
    %5 = vector.broadcast %cst_3 : f32 to vector<2x512xf32>
    %6 = arith.addf %5, %4 : vector<2x512xf32>
    %cst_4 = arith.constant 1.000000e+00 : f32
    %7 = vector.broadcast %cst_4 : f32 to vector<2x512xf32>
    %8 = arith.divf %7, %6 : vector<2x512xf32>
    %9 = arith.mulf %0, %8 : vector<2x512xf32>
    %c0_5 = arith.constant 0 : index
    %c0_6 = arith.constant 0 : index
    %10 = vector.load %arg4[%c0_5, %c0_6] : memref<2x512xf32, #tpu.memory_space<vmem>>, vector<2x512xf32>
    tpu.vector_store %arg4[%c0_5, %c0_6], %9 {strides = array<i32>} : memref<2x512xf32, #tpu.memory_space<vmem>>, vector<2x512xf32>,
    return
  }
  func.func @transform_0(%arg0: i32, %arg1: i32) -> (i32, i32) {
    %c0_i32 = arith.constant 0 : i32
    return %arg0, %arg1 : i32, i32
  }
  func.func @transform_1(%arg0: i32, %arg1: i32) -> (i32, i32) {
    %c1_i32 = arith.constant 1 : i32
    %0 = arith.addi %arg1, %c1_i32 : i32
    %c0_i32 = arith.constant 0 : i32
    return %arg0, %0 : i32, i32
  }
  func.func @transform_2(%arg0: i32, %arg1: i32) -> (i32, i32) {
    %c0_i32 = arith.constant 0 : i32
    return %arg0, %arg1 : i32, i32
  }
}

</mosaic_0001>

<bundles_post_ra>
// kernel: tpu_custom_call.1
= control target key start
LH: loop header
LB: loop body
LE: loop exit
PB: predicated region body
PF: predicated region fallthrough
CT: control target
= control target key end

     0   :  { %7 = vsyncpa [#allocation3], 0  ;;  %s211_s0 = inlined_call_operand.hbm [shape: f32[2,1024], index: 0, kind: input, shape index: {}]   ;;  %s212_s1 = inlined_call_operand.hbm [shape: f32[2,1024], index: 1, kind: input, shape index: {}]   ;;  %s213_s2 = inlined_call_operand.hbm [shape: f32[2,512], index: 2, kind: output, shape index: {}]  }
   0x1   :  { %8 = vsyncpa [#allocation6], 0 }
   0x2   :  { %9 = vsyncpa [#allocation4], 0  ;;  %s172_s11 = scalar_lea.hbm %s212_s1, 128  ;;  %s151_s12 = smov [#allocation2]  }
   0x3   :  { %s16_s13 = sshll.u32 %s151_s12, 4  ;;  %s152_s14 = smov [#allocation5]   ;;  %s17_s13 = int_to_ptr.vmem [resolvable:$true] %s16_s13 }
   0x4   :  { %s30_s15 = sshll.u32 %s152_s14, 4  ;;  %s76_s18 = scalar_lea.hbm %s211_s0, 128  ;;  %s31_s15 = int_to_ptr.vmem [resolvable:$true] %s30_s15 }
   0x5   :  { %p77_p0 = scmp.ne.s32.totalorder %s211_s0, %s76_s18  ;;  %s78_s23 = scalar_lea.hbm %s211_s0, 256 }
   0x6   :  { %p79_p1 = scmp.lt.u32.totalorder %s78_s23, %s76_s18  ;;  %p80_p2 = scmp.lt.u32.totalorder %s76_s18, %s211_s0 }
   0x8   :  { %p81_p3 = por %p80_p2, %p79_p1 }
   0xa   :  { %p82_p4 = pnand %p81_p3, %p77_p0 }
   0xc   :  { %85 = shalt.err (!%p82_p4)
}
   0xd   :  { %s86_s26 = scalar_lea.vmem %s17_s13, 128  ;;  %p91_p6 = scmp.lt.s32.totalorder %s17_s13, %s17_s13 }
   0xe   :  { %p87_p5 = scmp.ne.s32.totalorder %s17_s13, %s86_s26  ;;  %p92_p7 = scmp.lt.s32.totalorder %s86_s26, %s86_s26 }
  0x10   :  { %p93_p8 = por %p92_p7, %p91_p6 }
  0x12   :  { %p94_p9 = pnand %p93_p8, %p87_p5 }
  0x14   :  { %97 = shalt.err (!%p94_p9)
}
  0x15   :  { %19 = dma.hbm_to_vmem [thread:$0]  %s211_s0, 128, %s17_s13, [#allocation3]  }
  0x16   :  { %s122_s3 = scalar_lea.hbm %s212_s1, 256  ;;  %p101_p11 = scmp.lt.u32.totalorder %s172_s11, %s212_s1 }
  0x17   :  { %p99_p10 = scmp.ne.s32.totalorder %s172_s11, %s122_s3  ;;  %p102_p12 = scmp.lt.u32.totalorder %s122_s3, %s122_s3 }
  0x18   :  { %p104_p0 = scmp.lt.u32.totalorder %s122_s3, %s172_s11 }
  0x19   :  { %p103_p13 = por %p102_p12, %p101_p11 }
  0x1b   :  { %p105_p1 = por %p104_p0, %p103_p13 }
  0x1d   :  { %p106_p2 = pnand %p105_p1, %p99_p10 }
  0x1f   :  { %109 = shalt.err (!%p106_p2)
}
  0x20   :  { %s110_s6 = scalar_lea.vmem %s31_s15, 128  ;;  %p115_p4 = scmp.lt.s32.totalorder %s31_s15, %s31_s15 }
  0x21   :  { %p111_p3 = scmp.ne.s32.totalorder %s31_s15, %s110_s6  ;;  %p116_p5 = scmp.lt.s32.totalorder %s110_s6, %s110_s6 }
  0x23   :  { %p117_p6 = por %p116_p5, %p115_p4 }
  0x25   :  { %p118_p7 = pnand %p117_p6, %p111_p3 }
  0x27   :  { %121 = shalt.err (!%p118_p7)
}
  0x28   :  { %33 = dma.hbm_to_vmem [thread:$0]  %s172_s11, 128, %s31_s15, [#allocation6]  }
  0x29   :  { %145 = dma.done.wait [#allocation3], 128  }
  0x2a   :  { %146 = vsyncadd [#allocation3], 4294967168 }
  0x2b   :  { %147 = dma.done.wait [#allocation6], 128  }
  0x2c   :  { %148 = vsyncadd [#allocation6], 4294967168  ;;  %v43_v0 = vld [vmem:[#allocation5] sm:$0xff]  ;;  %v42_v5 = vld [vmem:[#allocation2] sm:$0xff]  ;;  %s153_s0 = smov [#allocation7]  }
  0x2d   :  { %v44_v1 = vsub.f32 0.0, %v43_v0  ;;  %s58_s1 = sshll.u32 %s153_s0, 4  ;;  %s59_s1 = int_to_ptr.vmem [resolvable:$true] %s58_s1 }
  0x2e   :  { %s123_s7 = scalar_lea.vmem %s59_s1, 128  ;;  %p128_p9 = scmp.lt.s32.totalorder %s59_s1, %s59_s1 }
  0x2f   :  { %v45_v2 = vmul.f32 1.442695, %v44_v1  ;;  %p124_p8 = scmp.ne.s32.totalorder %s59_s1, %s123_s7  ;;  %p129_p10 = scmp.lt.s32.totalorder %s123_s7, %s123_s7 }
  0x31   :  { %72 = vpow2.f32 %v45_v2  ;;  %p130_p11 = por %p129_p10, %p128_p9 }
  0x33   :  { %p131_p12 = pnand %p130_p11, %p124_p8 }
  0x3b   :  { %v73_v3 = vpop.eup %72 }
  0x3c   :  { %v47_v4 = vadd.f32 1.0, %v73_v3 }
  0x3e   :  { %74 = vrcp.f32 %v47_v4 }
  0x48   :  { %v75_v6 = vpop.eup %74 }
  0x49   :  { %v50_v7 = vmul.f32 %v75_v6, %v42_v5 }
  0x4b   :  { %51 = vst [vmem:[#allocation7] sm:$0xff] %v50_v7 }
  0x4c   :  { %134 = shalt.err (!%p131_p12)
}
  0x4d   :  { %s135_s10 = scalar_lea.hbm %s213_s2, 128 }
  0x4e   :  { %p136_p13 = scmp.ne.s32.totalorder %s213_s2, %s135_s10  ;;  %p139_p0 = scmp.lt.u32.totalorder %s135_s10, %s213_s2 }
  0x50   :  { %p141_p1 = pnand %p139_p0, %p136_p13 }
  0x52   :  { %144 = shalt.err (!%p141_p1)
}
  0x53   :  { %61 = dma.vmem_to_hbm [thread:$0]  %s59_s1, 128, %s213_s2, [#allocation4]  }
  0x54   :  { %149 = dma.done.wait [#allocation4], 128  }
  0x55   :  { %150 = vsyncadd [#allocation4], 4294967168 }
  0x56   :  { %65 = vsyncpa [#allocation3], 1 }
  0x57   :  { %66 = vsyncpa [#allocation6], 1 }
  0x58   :  { %67 = vsyncpa [#allocation4], 1 }

</bundles_post_ra>
